<compile_context>
chip_gen: v6e
topology: v6e:2x2x1
jax: 0.10.0
libtpu: 0.0.40
codegen_flags: <defaults>
</compile_context>

<pallas_src>
import functools

import jax
import jax.numpy as jnp
from jax.experimental import pallas as pl
from jax.experimental.pallas import tpu as pltpu


def _reward_kernel(x_ref, lw_ref, ylast_ref, yprev_ref, out_ref, *, c):
    # Blocks: [TB, N] in the inputs' original dtype; batch on sublanes,
    # assets on lanes (N == full minor dim -> contiguous DMA, no transpose).
    y_last = ylast_ref[...].astype(jnp.float32)
    y_prev = yprev_ref[...].astype(jnp.float32)
    last_w = lw_ref[...].astype(jnp.float32)
    x = x_ref[...].astype(jnp.float32)

    changes = y_last / y_prev                                 # price-change ratio
    cw = changes * last_w                                     # [TB, N]
    s = jnp.sum(cw, axis=1, keepdims=True)                    # [TB, 1] lane (XLU) reduce
    wt_prime = cw / s                                         # exact division
    turnover = jnp.sum(jnp.abs(wt_prime - x), axis=1, keepdims=True)
    mu = 1.0 - c * turnover                                   # c is a folded constant
    pv = s * mu                                               # [TB, 1]

    # Packed output: column 0 = portfolio value, column 1 = log(pv).
    out_ref[:, 0:1] = pv
    out_ref[:, 1:2] = jnp.log(pv)


def _vmem_budget():
    """Generation-aware VMEM budget (v5e/v6e: 128 MiB, v7x: 64 MiB)."""
    vmem_cap = 64 * 1024 * 1024                               # conservative default (v7x)
    try:
        cap = int(pltpu.get_tpu_info().vmem_capacity_bytes)
        if cap > 0:
            vmem_cap = cap
    except Exception:
        pass
    vmem_limit = (vmem_cap * 3) // 4                          # scoped limit w/ headroom
    tile_budget = vmem_limit // 2                             # room for temps / scratch
    return vmem_limit, tile_budget


def _pick_batch_tile(batch, n_assets, in_itemsize, tile_budget_bytes):
    """Largest batch tile within the VMEM budget; whole batch if it fits."""
    # Per batch row, per grid step:
    #   4 input streams x 2 pipeline buffers x N x itemsize
    # + ~6 f32 [tb, N] in-kernel temporaries (conservative)
    # + the packed f32 output (2 cols, double buffered).
    per_row = n_assets * (4 * 2 * in_itemsize + 6 * 4) + 2 * 2 * 4
    cap = max(8, int(tile_budget_bytes) // max(per_row, 1))

    if batch <= cap:
        return batch                                          # single block: grid=(1,)

    # Largest lane-aligned (multiple-of-128) tile under the cap dividing batch.
    tb = (cap // 128) * 128
    while tb >= 128:
        if batch % tb == 0:
            return tb
        tb -= 128

    # No aligned divisor: largest sublane-aligned divisor (keeps blocks legal).
    tb = (cap // 8) * 8
    while tb >= 8:
        if batch % tb == 0:
            return tb
        tb -= 8

    # Last resort: lane-aligned tile with a padded (masked) final block.
    return max(128, (cap // 128) * 128)


def reward_loss(x, y, last_w, future_changes=None, c=0.0025):
    """JAX/Pallas equivalent of RewardLoss.forward.

    x:        [B, N] current portfolio weights
    y:        [B, N, W] price windows (W >= 2)
    last_w:   [B, N] previous portfolio weights
    future_changes: unused (mirrors the PyTorch signature)
    returns (reward: scalar, portfolio_value: [B])
    """
    B, N = x.shape

    # TODO(synk): datautils.price_change is external; approximated here as the
    # per-asset ratio of the last two price ticks.
    y_last = y[..., -1]                                       # [B, N], original dtype
    y_prev = y[..., -2]                                       # [B, N], original dtype

    in_itemsize = max(jnp.dtype(a.dtype).itemsize for a in (x, last_w, y))
    vmem_limit, tile_budget = _vmem_budget()
    tb = _pick_batch_tile(B, N, in_itemsize, tile_budget)
    grid = (pl.cdiv(B, tb),)

    block_in = pl.BlockSpec((tb, N), lambda i: (i, 0))

    out = pl.pallas_call(
        functools.partial(_reward_kernel, c=float(c)),
        grid=grid,
        in_specs=[block_in, block_in, block_in, block_in],
        out_specs=pl.BlockSpec((tb, 2), lambda i: (i, 0)),
        out_shape=jax.ShapeDtypeStruct((B, 2), jnp.float32),
        compiler_params=pltpu.CompilerParams(
            # "parallel" lets the runtime split batch tiles across TCs on v7x;
            # CORE_PARALLEL only pays off at large B, so the default is kept.
            dimension_semantics=("parallel",),
            vmem_limit_bytes=int(vmem_limit),
        ),
    )(x, last_w, y_last, y_prev)

    pv = out[:, 0]                                            # [B]
    reward = -jnp.mean(out[:, 1])                             # tiny B-elem reduce
    return reward, pv


def _reference(x, y, last_w, c=0.0025):
    x = x.astype(jnp.float32)
    last_w = last_w.astype(jnp.float32)
    y = y.astype(jnp.float32)
    changes = y[:, :, -1] / y[:, :, -2]
    cw = changes * last_w
    s = jnp.sum(cw, axis=1, keepdims=True)
    wt_prime = cw / s
    mu = 1.0 - jnp.sum(jnp.abs(wt_prime - x), axis=1) * c
    pv = s[:, 0] * mu
    return -jnp.mean(jnp.log(pv)), pv


if __name__ == "__main__":
    key = jax.random.PRNGKey(0)
    B, N, W = 8, 8, 4

    kx, kw, ky = jax.random.split(key, 3)
    # Portfolio weight vectors (rows sum to 1), strictly positive prices.
    x = jax.nn.softmax(jax.random.normal(kx, (B, N)), axis=1)
    last_w = jax.nn.softmax(jax.random.normal(kw, (B, N)), axis=1)
    y = jnp.abs(1.0 + 0.05 * jax.random.normal(ky, (B, N, W))) + 0.5

    fn = jax.jit(lambda x_, y_, w_: reward_loss(x_, y_, w_, None))
    reward, pv = fn(x, y, last_w)
    jax.block_until_ready((reward, pv))

    ref_reward, ref_pv = _reference(x, y, last_w)
    assert jnp.allclose(reward, ref_reward, atol=1e-5, rtol=1e-4), (reward, ref_reward)
    assert jnp.allclose(pv, ref_pv, atol=1e-5, rtol=1e-4), (pv, ref_pv)

    print("KERNEL_OK")
</pallas_src>

<mosaic_0001>
module attributes {stable_mosaic.version = 11 : i64} {
  func.func @_reward_kernel(%arg0: i32, %arg1: memref<8x8xf32, #tpu.memory_space<vmem>>, %arg2: memref<8x8xf32, #tpu.memory_space<vmem>>, %arg3: memref<8x8xf32, #tpu.memory_space<vmem>>, %arg4: memref<8x8xf32, #tpu.memory_space<vmem>>, %arg5: memref<8x2xf32, #tpu.memory_space<vmem>>) attributes {dimension_semantics = [#tpu.dimension_semantics<parallel>], iteration_bounds = array<i64: 1>, scalar_prefetch = 0 : i64, scratch_operands = 0 : i64, tpu.core_type = #tpu.core_type<tc>, window_params = [{transform_indices = @transform_0, window_bounds = array<i64: 8, 8>}, {transform_indices = @transform_1, window_bounds = array<i64: 8, 8>}, {transform_indices = @transform_2, window_bounds = array<i64: 8, 8>}, {transform_indices = @transform_3, window_bounds = array<i64: 8, 8>}, {transform_indices = @transform_4, window_bounds = array<i64: 8, 2>}]} {
    %c0 = arith.constant 0 : index
    %c0_0 = arith.constant 0 : index
    %0 = vector.load %arg3[%c0, %c0_0] : memref<8x8xf32, #tpu.memory_space<vmem>>, vector<8x8xf32>
    %c0_1 = arith.constant 0 : index
    %c0_2 = arith.constant 0 : index
    %1 = vector.load %arg4[%c0_1, %c0_2] : memref<8x8xf32, #tpu.memory_space<vmem>>, vector<8x8xf32>
    %c0_3 = arith.constant 0 : index
    %c0_4 = arith.constant 0 : index
    %2 = vector.load %arg2[%c0_3, %c0_4] : memref<8x8xf32, #tpu.memory_space<vmem>>, vector<8x8xf32>
    %c0_5 = arith.constant 0 : index
    %c0_6 = arith.constant 0 : index
    %3 = vector.load %arg1[%c0_5, %c0_6] : memref<8x8xf32, #tpu.memory_space<vmem>>, vector<8x8xf32>
    %4 = arith.divf %0, %1 : vector<8x8xf32>
    %5 = arith.mulf %4, %2 : vector<8x8xf32>
    %cst = arith.constant dense<0.000000e+00> : vector<8xf32>
    %6 = vector.multi_reduction <add>, %5, %cst [1] : vector<8x8xf32> to vector<8xf32>
    %7 = vector.shape_cast %6 : vector<8xf32> to vector<8x1xf32>
    %8 = vector.broadcast %7 : vector<8x1xf32> to vector<8x8xf32>
    %9 = arith.divf %5, %8 : vector<8x8xf32>
    %10 = arith.subf %9, %3 : vector<8x8xf32>
    %11 = math.absf %10 : vector<8x8xf32>
    %cst_7 = arith.constant dense<0.000000e+00> : vector<8xf32>
    %12 = vector.multi_reduction <add>, %11, %cst_7 [1] : vector<8x8xf32> to vector<8xf32>
    %13 = vector.shape_cast %12 : vector<8xf32> to vector<8x1xf32>
    %cst_8 = arith.constant 2.500000e-03 : f32
    %14 = vector.broadcast %cst_8 : f32 to vector<8x1xf32>
    %15 = arith.mulf %14, %13 : vector<8x1xf32>
    %cst_9 = arith.constant 1.000000e+00 : f32
    %16 = vector.broadcast %cst_9 : f32 to vector<8x1xf32>
    %17 = arith.subf %16, %15 : vector<8x1xf32>
    %18 = arith.mulf %7, %17 : vector<8x1xf32>
    %c0_10 = arith.constant 0 : index
    %c0_11 = arith.constant 0 : index
    %19 = vector.load %arg5[%c0_10, %c0_11] : memref<8x2xf32, #tpu.memory_space<vmem>>, vector<8x1xf32>
    tpu.vector_store %arg5[%c0_10, %c0_11], %18 {strides = array<i32>} : memref<8x2xf32, #tpu.memory_space<vmem>>, vector<8x1xf32>,
    %20 = math.log %18 : vector<8x1xf32>
    %c0_12 = arith.constant 0 : index
    %c1 = arith.constant 1 : index
    %21 = vector.load %arg5[%c0_12, %c1] : memref<8x2xf32, #tpu.memory_space<vmem>>, vector<8x1xf32>
    tpu.vector_store %arg5[%c0_12, %c1], %20 {strides = array<i32>} : memref<8x2xf32, #tpu.memory_space<vmem>>, vector<8x1xf32>,
    return
  }
  func.func @transform_0(%arg0: i32) -> (i32, i32) {
    %c0_i32 = arith.constant 0 : i32
    %c0_i32_0 = arith.constant 0 : i32
    return %arg0, %c0_i32 : i32, i32
  }
  func.func @transform_1(%arg0: i32) -> (i32, i32) {
    %c0_i32 = arith.constant 0 : i32
    %c0_i32_0 = arith.constant 0 : i32
    return %arg0, %c0_i32 : i32, i32
  }
  func.func @transform_2(%arg0: i32) -> (i32, i32) {
    %c0_i32 = arith.constant 0 : i32
    %c0_i32_0 = arith.constant 0 : i32
    return %arg0, %c0_i32 : i32, i32
  }
  func.func @transform_3(%arg0: i32) -> (i32, i32) {
    %c0_i32 = arith.constant 0 : i32
    %c0_i32_0 = arith.constant 0 : i32
    return %arg0, %c0_i32 : i32, i32
  }
  func.func @transform_4(%arg0: i32) -> (i32, i32) {
    %c0_i32 = arith.constant 0 : i32
    %c0_i32_0 = arith.constant 0 : i32
    return %arg0, %c0_i32 : i32, i32
  }
}

</mosaic_0001>

<bundles_post_ra>
// kernel: _lambda_.1
= control target key start
LH: loop header
LB: loop body
LE: loop exit
PB: predicated region body
PF: predicated region fallthrough
CT: control target
= control target key end

     0   :  { %vm24_vm0 = vcmask 64512   ;;  %vm38_vm1 = vcmask 7168   ;;  %vm42_vm2 = vcmask 15368   ;;  %s97_s3 = inlined_call_operand.vmem [shape: f32[8,8], index: 3, kind: input, shape index: {}]   ;;  %s98_s2 = inlined_call_operand.vmem [shape: f32[8,8], index: 2, kind: input, shape index: {}]   ;;  %s99_s1 = inlined_call_operand.vmem [shape: f32[8,8], index: 1, kind: input, shape index: {}]   ;;  %s100_s0 = inlined_call_operand.vmem [shape: f32[8,8], index: 0, kind: input, shape index: {}]   ;;  %s101_s4 = inlined_call_operand.vmem [shape: f32[8,2], index: 4, kind: output, shape index: {}]  }
   0x1   :  { %v18_v0 = vld [vmem:[%s97_s3] sm:$0xff] }
   0x2   :  { %48 = vrcp.f32 %v18_v0  ;;  %v17_v1 = vld [vmem:[%s98_s2] sm:$0xff] }
   0x3   :  { %v19_v3 = vld [vmem:[%s99_s1] sm:$0xff] }
   0x4   :  { %v20_v9 = vld [vmem:[%s100_s0] sm:$0xff] }
   0xf   :  { %v49_v2 = vpop.eup %48 }
  0x10   :  { %v22_v4 = vmul.f32 %v49_v2, %v17_v1 }
  0x12   :  { %v23_v5 = vmul.f32 %v22_v4, %v19_v3 }
  0x14   :  { %v25_v6 = vsel %vm24_vm0, %v23_v5, 0.0 }
  0x15   :  { %26 = vadd.xlane.f32.xlu0 %v25_v6 }
  0x9e   :  { %v27_v7 = vpop.xlane.xlu0 %26 }
  0x9f   :  { %50 = vrcp.f32 %v27_v7 }
  0xac   :  { %v51_v8 = vpop.eup %50 }
  0xad   :  { %v29_v10 = vmul.f32 %v51_v8, %v23_v5 }
  0xaf   :  { %v30_v11 = vsub.f32 %v29_v10, %v20_v9 }
  0xb1   :  { %v31_v12 = vand.u32 2147483647, %v30_v11 }
  0xb3   :  { %v32_v13 = vsel %vm24_vm0, %v31_v12, 0.0 }
  0xb4   :  { %33 = vadd.xlane.f32.xlu0 %v32_v13 }
 0x13d   :  { %v34_v14 = vpop.xlane.xlu0 %33 }
 0x13e   :  { %v35_v15 = vmul.f32 0.0025, %v34_v14 }
 0x140   :  { %v36_v16 = vsub.f32 1.0, %v35_v15 }
 0x142   :  { %v37_v17 = vmul.f32 %v36_v16, %v27_v7 }
 0x144   :  { %39 = vst.msk [vmem:[%s101_s4] sm:$0xff] %vm38_vm1, %v37_v17  ;;  %52 = vlog2.f32 %v37_v17 }
 0x151   :  { %v53_v18 = vpop.eup %52 }
 0x152   :  { %v41_v19 = vmul.f32 0.6931472, %v53_v18 }
 0x154   :  { %43 = vst.msk [vmem:[%s101_s4] sm:$0xff] %vm42_vm2, %v41_v19 }

</bundles_post_ra>
